<compile_context>
chip_gen: v7x
topology: tpu7x:2x2x1
jax: 0.10.0
libtpu: 0.0.40
codegen_flags: <defaults>
</compile_context>

<pallas_src>
import numpy as np
import jax
import jax.numpy as jnp
from jax.experimental import pallas as pl
from jax.experimental.pallas import tpu as pltpu


# --------------------------------------------------------------------------
# Fused Pallas kernel: all mode products + dual regulariser in one pass
# --------------------------------------------------------------------------
def _fused_tt_kernel(kl_ref, kr_ref, c_ref, t_ref, reg_ref):
    # kl_ref : (BN, BN) bf16  block-diag kron(I_B, K1)      (VMEM-resident)
    # kr_ref : (M,  M)  bf16  kron(K_2^T, ..., K_K^T, I_r2) (VMEM-resident)
    # c_ref  : (BN, M)  f32   row-block of the matricized core
    # t_ref  : (BN, M)  f32   T   = kron(I_B,K1) @ C @ R
    # reg_ref: (BN, M)  f32   reg = T * C
    c = c_ref[...]                                            # f32, kept for reg
    t = jnp.dot(kl_ref[...], c.astype(jnp.bfloat16),          # mode-1 product
                preferred_element_type=jnp.float32)
    t = jnp.dot(t.astype(jnp.bfloat16), kr_ref[...],          # modes 2..K product
                preferred_element_type=jnp.float32)
    t_ref[...] = t
    reg_ref[...] = t * c                                      # dual regulariser (VPU, f32)


def fused_tt_forward(k_left_block, k_right, core2, block_rows):
    """core2: (r1*n1, M) f32 ; k_left_block: (BN,BN) bf16 ; k_right: (M,M) bf16."""
    R, M = core2.shape
    BN = int(block_rows)
    num_blocks = pl.cdiv(R, BN)
    out_sds = jax.ShapeDtypeStruct((R, M), jnp.float32)

    # Explicit scoped-VMEM budget: operators (double-buffered by the default
    # pipeliner) + core/T/reg blocks (double-buffered) + headroom.
    vmem_bytes = (2 * BN * BN * 2          # kron(I_B, K1), bf16
                  + 2 * M * M * 2          # k_right, bf16
                  + 2 * 3 * BN * M * 4     # core / T / reg blocks, f32
                  + (8 << 20))             # headroom for intermediates
    vmem_bytes = int(min(max(vmem_bytes, 32 << 20), 64 << 20))

    t2, reg2 = pl.pallas_call(
        _fused_tt_kernel,
        out_shape=(out_sds, out_sds),
        grid=(num_blocks,),
        in_specs=[
            pl.BlockSpec((BN, BN), lambda i: (0, 0)),   # left operator, resident
            pl.BlockSpec((M, M), lambda i: (0, 0)),     # right operator, resident
            pl.BlockSpec((BN, M), lambda i: (i, 0)),    # core row-block
        ],
        out_specs=[
            pl.BlockSpec((BN, M), lambda i: (i, 0)),    # T
            pl.BlockSpec((BN, M), lambda i: (i, 0)),    # reg
        ],
        compiler_params=pltpu.CompilerParams(
            dimension_semantics=("parallel",),          # shards blocks across TCs
            vmem_limit_bytes=vmem_bytes),
    )(k_left_block, k_right, core2)
    return t2, reg2


# --------------------------------------------------------------------------
# Setup-time kernel construction (mirrors assign_kernel / set_side_info;
# runs once at __init__ under no_grad in the torch module -> plain numpy).
# --------------------------------------------------------------------------
def rbf_gram(X):
    X = np.asarray(X, np.float64)
    d2 = np.maximum(np.sum((X[:, None, :] - X[None, :, :]) ** 2, axis=-1), 0.0)
    d = np.sqrt(d2)
    raw_ls = np.sqrt(np.median(d[d > 0]))          # get_median_ls
    ls = np.log1p(np.exp(raw_ls))                  # gpytorch Positive() softplus
    K = np.exp(-0.5 * d2 / (ls ** 2))              # gpytorch RBFKernel.evaluate()
    return jnp.asarray(K, jnp.float32)


# --------------------------------------------------------------------------
# TT_kernel_component (Pallas version)
# --------------------------------------------------------------------------
class TTKernelComponentPallas:
    def __init__(self, r_1, n_list, r_2, side_info_list, init_scale=1.0,
                 full_grad=True, key=None):
        self.r_1, self.r_2 = r_1, r_2
        self.n_list = list(n_list)
        self.full_grad = full_grad
        self.shape_list = [r_1] + list(n_list) + [r_2]
        # permutation_list = [1..K, 0, -1]  (resolve -1 to last axis for jnp)
        self.permutation_list = [i + 1 for i in range(len(n_list))] \
                                + [0, len(self.shape_list) - 1]
        if key is None:
            key = jax.random.PRNGKey(0)
        # core_param = init_scale * randn(shape_list)
        self.core_param = init_scale * jax.random.normal(
            key, tuple(self.shape_list), dtype=jnp.float32)
        # n_dict[mode] = RBF gram matrix of side information (dual=True path)
        self.n_dict = {i + 1: rbf_gram(X) for i, X in enumerate(side_info_list)}
        self._build_operators()

    def _build_operators(self):
        """Precompute the fused left / right operators (once, at setup)."""
        K = len(self.n_list)
        n1 = self.n_list[0]
        K1 = self.n_dict.get(1)
        k_left = (np.asarray(K1, np.float32) if K1 is not None
                  else np.eye(n1, dtype=np.float32))
        # right operator: K_2^T (x) K_3^T (x) ... (x) K_K^T (x) I_{r2}
        right = np.eye(self.r_2, dtype=np.float32)
        for mode in range(K, 1, -1):
            Kk = self.n_dict.get(mode)
            mat = (np.asarray(Kk, np.float32).T if Kk is not None
                   else np.eye(self.n_list[mode - 1], dtype=np.float32))
            right = np.kron(mat, right)
        self.M = right.shape[0]                      # = prod(n_2..n_K) * r_2
        # Batch B r1-slices per grid step: target ~256 rows (fills v6e/v7x MXU,
        # multiple of 128 so it does not over-pad v5e's 128-wide MXU).
        target_rows = 256
        B = max(1, min(self.r_1, max(1, target_rows // n1)))
        self.block_r1 = B
        self.block_rows = B * n1
        # block-diag left operator -> the mode-1 product is ONE wide matmul
        k_left_block = np.kron(np.eye(B, dtype=np.float32), k_left)
        self.k_left_block = jnp.asarray(k_left_block, jnp.bfloat16)
        self.k_right = jnp.asarray(right, jnp.bfloat16)

    def forward(self, indices=None):
        # free (no-copy) matricization of the TT core: (r1*n1, M)
        core2 = self.core_param.reshape(self.r_1 * self.n_list[0], self.M)
        T2, reg2 = fused_tt_forward(self.k_left_block, self.k_right, core2,
                                    self.block_rows)
        T = T2.reshape(tuple(self.shape_list))
        reg = reg2.reshape(tuple(self.shape_list))
        if self.full_grad:
            return T, reg
        # non-full_grad: T.permute(permutation_list)[indices] (tiny gather, glue)
        Tp = jnp.transpose(T, self.permutation_list)
        idx = tuple(indices[:, j] for j in range(indices.shape[1])) \
            if indices.ndim > 1 else (indices,)
        return Tp[idx], reg


# --------------------------------------------------------------------------
if __name__ == "__main__":
    key = jax.random.PRNGKey(0)
    k_core, k_x1, k_x2 = jax.random.split(key, 3)

    r_1, r_2 = 2, 4
    n_list = [8, 32]          # -> lane dim M = 32*4 = 128 (lane-dense output)
    X1 = jax.random.normal(k_x1, (n_list[0], 3), dtype=jnp.float32)
    X2 = jax.random.normal(k_x2, (n_list[1], 5), dtype=jnp.float32)

    comp = TTKernelComponentPallas(r_1, n_list, r_2, [X1, X2],
                                   init_scale=1.0, full_grad=True, key=k_core)

    T, reg = comp.forward()
    T = jax.block_until_ready(T)
    reg = jax.block_until_ready(reg)

    # also exercise the indexed (full_grad=False) path
    comp.full_grad = False
    indices = jnp.array([[0, 0], [3, 7], [7, 31]], dtype=jnp.int32)
    T_idx, reg2 = comp.forward(indices)
    T_idx = jax.block_until_ready(T_idx)

    # ---- reference check (uses the same bf16-rounded operands the MXU sees) --
    def bf16(x):
        return np.asarray(jnp.asarray(x).astype(jnp.bfloat16).astype(jnp.float32),
                          np.float64)

    core_f = np.asarray(comp.core_param, np.float64)
    core_b = bf16(comp.core_param)
    K1b = bf16(comp.n_dict[1])
    K2b = bf16(comp.n_dict[2])
    T1 = np.einsum('ij,ajlb->ailb', K1b, core_b)     # mode-1 product
    T1 = bf16(T1)                                    # kernel recasts intermediate
    T_ref = np.einsum('kl,ailb->aikb', K2b, T1)      # mode-2 product
    reg_ref = T_ref * core_f

    def rel_err(a, b):
        b = np.asarray(b, np.float64)
        return np.linalg.norm(np.asarray(a, np.float64) - b) / max(
            np.linalg.norm(b), 1e-12)

    e_T, e_r = rel_err(T, T_ref), rel_err(reg, reg_ref)
    ok = (e_T < 3e-2 and e_r < 3e-2
          and T.shape == (r_1, n_list[0], n_list[1], r_2)
          and T_idx.shape == (3, r_1, r_2))
    if ok:
        print("KERNEL_OK")
    else:
        raise SystemExit(f"mismatch vs reference: T err={e_T:.3e}, reg err={e_r:.3e}")
</pallas_src>

<mosaic_0001>
module attributes {stable_mosaic.version = 11 : i64} {
  func.func @_fused_tt_kernel(%arg0: i32, %arg1: memref<16x16xbf16, #tpu.memory_space<vmem>>, %arg2: memref<128x128xbf16, #tpu.memory_space<vmem>>, %arg3: memref<16x128xf32, #tpu.memory_space<vmem>>, %arg4: memref<16x128xf32, #tpu.memory_space<vmem>>, %arg5: memref<16x128xf32, #tpu.memory_space<vmem>>) attributes {dimension_semantics = [#tpu.dimension_semantics<parallel>], iteration_bounds = array<i64: 1>, scalar_prefetch = 0 : i64, scratch_operands = 0 : i64, tpu.core_type = #tpu.core_type<tc>, window_params = [{pipeline_mode = #tpu.pipeline_mode<synchronous>, transform_indices = @transform_0, window_bounds = array<i64: 16, 16>}, {pipeline_mode = #tpu.pipeline_mode<synchronous>, transform_indices = @transform_1, window_bounds = array<i64: 128, 128>}, {transform_indices = @transform_2, window_bounds = array<i64: 16, 128>}, {transform_indices = @transform_3, window_bounds = array<i64: 16, 128>}, {transform_indices = @transform_4, window_bounds = array<i64: 16, 128>}]} {
    %c0 = arith.constant 0 : index
    %c0_0 = arith.constant 0 : index
    %0 = vector.load %arg3[%c0, %c0_0] : memref<16x128xf32, #tpu.memory_space<vmem>>, vector<16x128xf32>
    %c0_1 = arith.constant 0 : index
    %c0_2 = arith.constant 0 : index
    %1 = vector.load %arg1[%c0_1, %c0_2] : memref<16x16xbf16, #tpu.memory_space<vmem>>, vector<16x16xbf16>
    %2 = arith.truncf %0 : vector<16x128xf32> to vector<16x128xbf16>
    %cst = arith.constant dense<0.000000e+00> : vector<16x128xf32>
    %3 = tpu.matmul %1, %2, %cst {dimension_numbers = #tpu.dot_dimension_numbers<[1], [0], [0], [1], [0, 0, 1, 1], [], []>} : vector<16x16xbf16>, vector<16x128xbf16>, vector<16x128xf32> -> vector<16x128xf32>
    %4 = arith.truncf %3 : vector<16x128xf32> to vector<16x128xbf16>
    %c0_3 = arith.constant 0 : index
    %c0_4 = arith.constant 0 : index
    %5 = vector.load %arg2[%c0_3, %c0_4] : memref<128x128xbf16, #tpu.memory_space<vmem>>, vector<128x128xbf16>
    %cst_5 = arith.constant dense<0.000000e+00> : vector<16x128xf32>
    %6 = tpu.matmul %4, %5, %cst_5 {dimension_numbers = #tpu.dot_dimension_numbers<[1], [0], [0], [1], [0, 0, 1, 1], [], []>} : vector<16x128xbf16>, vector<128x128xbf16>, vector<16x128xf32> -> vector<16x128xf32>
    %c0_6 = arith.constant 0 : index
    %c0_7 = arith.constant 0 : index
    %7 = vector.load %arg4[%c0_6, %c0_7] : memref<16x128xf32, #tpu.memory_space<vmem>>, vector<16x128xf32>
    tpu.vector_store %arg4[%c0_6, %c0_7], %6 {strides = array<i32>} : memref<16x128xf32, #tpu.memory_space<vmem>>, vector<16x128xf32>,
    %8 = arith.mulf %6, %0 : vector<16x128xf32>
    %c0_8 = arith.constant 0 : index
    %c0_9 = arith.constant 0 : index
    %9 = vector.load %arg5[%c0_8, %c0_9] : memref<16x128xf32, #tpu.memory_space<vmem>>, vector<16x128xf32>
    tpu.vector_store %arg5[%c0_8, %c0_9], %8 {strides = array<i32>} : memref<16x128xf32, #tpu.memory_space<vmem>>, vector<16x128xf32>,
    return
  }
  func.func @transform_0(%arg0: i32) -> (i32, i32) {
    %c0_i32 = arith.constant 0 : i32
    %c0_i32_0 = arith.constant 0 : i32
    %c0_i32_1 = arith.constant 0 : i32
    return %c0_i32, %c0_i32_0 : i32, i32
  }
  func.func @transform_1(%arg0: i32) -> (i32, i32) {
    %c0_i32 = arith.constant 0 : i32
    %c0_i32_0 = arith.constant 0 : i32
    %c0_i32_1 = arith.constant 0 : i32
    return %c0_i32, %c0_i32_0 : i32, i32
  }
  func.func @transform_2(%arg0: i32) -> (i32, i32) {
    %c0_i32 = arith.constant 0 : i32
    %c0_i32_0 = arith.constant 0 : i32
    return %arg0, %c0_i32 : i32, i32
  }
  func.func @transform_3(%arg0: i32) -> (i32, i32) {
    %c0_i32 = arith.constant 0 : i32
    %c0_i32_0 = arith.constant 0 : i32
    return %arg0, %c0_i32 : i32, i32
  }
  func.func @transform_4(%arg0: i32) -> (i32, i32) {
    %c0_i32 = arith.constant 0 : i32
    %c0_i32_0 = arith.constant 0 : i32
    return %arg0, %c0_i32 : i32, i32
  }
}

</mosaic_0001>

<bundles_post_ra>
// kernel: tpu_custom_call.1
= control target key start
LH: loop header
LB: loop body
LE: loop exit
PB: predicated region body
PF: predicated region fallthrough
CT: control target
= control target key end

     0   :  { %10 = vsyncpa [#allocation3], 0  ;;  %s565_s0 = inlined_call_operand.hbm [shape: bf16[16,16], index: 0, kind: input, shape index: {}]   ;;  %s566_s1 = inlined_call_operand.hbm [shape: bf16[128,128], index: 1, kind: input, shape index: {}]   ;;  %s567_s2 = inlined_call_operand.hbm [shape: f32[16,128], index: 2, kind: input, shape index: {}]   ;;  %s568_s3 = inlined_call_operand.hbm [shape: f32[16,128], index: 3, kind: output, shape index: {0}]   ;;  %s569_s4 = inlined_call_operand.hbm [shape: f32[16,128], index: 4, kind: output, shape index: {1}]  }
   0x1   :  { %11 = vsyncpa [#allocation6], 0 }
   0x2   :  { %12 = vsyncpa [#allocation4], 0 }
   0x3   :  { %13 = vsyncpa [#allocation10], 0  ;;  %s446_s15 = smov [#allocation5]   ;;  %s447_s17 = smov [#allocation2]  }
   0x4   :  { %s31_s16 = sshll.u32 %s446_s15, 4  ;;  %s19_s18 = sshll.u32 %s447_s17, 4  ;;  %s32_s16 = int_to_ptr.vmem [resolvable:$true] %s31_s16  ;;  %s482_s18 = int_to_ptr.vmem [resolvable:$true] %s19_s18 }
   0x5   :  { %s328_s21 = scalar_lea.hbm %s566_s1, 1024 }
   0x6   :  { %p329_p0 = scmp.ne.s32.totalorder %s566_s1, %s328_s21  ;;  %p332_p1 = scmp.lt.u32.totalorder %s328_s21, %s566_s1 }
   0x8   :  { %p334_p2 = pnand %p332_p1, %p329_p0 }
   0xa   :  { %337 = shalt.err (!%p334_p2)
}
   0xb   :  { %s338_s26 = scalar_lea.vmem %s32_s16, 1024  ;;  %p343_p4 = scmp.lt.s32.totalorder %s32_s16, %s32_s16 }
   0xc   :  { %p339_p3 = scmp.ne.s32.totalorder %s32_s16, %s338_s26  ;;  %p344_p5 = scmp.lt.s32.totalorder %s338_s26, %s338_s26 }
   0xe   :  { %p345_p6 = por %p344_p5, %p343_p4 }
  0x10   :  { %p346_p7 = pnand %p345_p6, %p339_p3 }
  0x12   :  { %349 = shalt.err (!%p346_p7)
}
  0x13   :  { %s448_s27 = smov 64   ;;  %s449_s28 = smov 4  }
  0x14   :  { %37 = dma.hbm_to_vmem [thread:$0]  %s566_s1, 1024, %s32_s16, [#allocation6], %s448_s27, %s448_s27, %s449_s28  }
  0x15   :  { %s350_s7 = scalar_lea.hbm %s565_s0, 128 }
  0x16   :  { %p351_p8 = scmp.ne.s32.totalorder %s565_s0, %s350_s7  ;;  %p354_p9 = scmp.lt.u32.totalorder %s350_s7, %s565_s0 }
  0x18   :  { %p356_p10 = pnand %p354_p9, %p351_p8 }
  0x1a   :  { %359 = shalt.err (!%p356_p10)
}
  0x1b   :  { %s360_s12 = scalar_lea.vmem %s482_s18, 128  ;;  %p365_p12 = scmp.lt.s32.totalorder %s482_s18, %s482_s18 }
  0x1c   :  { %p361_p11 = scmp.ne.s32.totalorder %s482_s18, %s360_s12  ;;  %p366_p13 = scmp.lt.s32.totalorder %s360_s12, %s360_s12 }
  0x1e   :  { %p367_p0 = por %p366_p13, %p365_p12 }
  0x20   :  { %p368_p1 = pnand %p367_p0, %p361_p11 }
  0x22   :  { %371 = shalt.err (!%p368_p1)
}
  0x23   :  { %25 = dma.hbm_to_vmem [thread:$0]  %s565_s0, 128, %s482_s18, [#allocation3], %s448_s27, %s448_s27, %s449_s28  }
  0x24   :  { %s450_s14 = smov [#allocation7]   ;;  %s372_s19 = scalar_lea.hbm %s567_s2, 256 }
  0x25   :  { %s43_s15 = sshll.u32 %s450_s14, 4  ;;  %p373_p2 = scmp.ne.s32.totalorder %s567_s2, %s372_s19  ;;  %s44_s15 = int_to_ptr.vmem [resolvable:$true] %s43_s15 }
  0x26   :  { %p376_p3 = scmp.lt.u32.totalorder %s372_s19, %s567_s2 }
  0x28   :  { %p378_p4 = pnand %p376_p3, %p373_p2 }
  0x2a   :  { %381 = shalt.err (!%p378_p4)
}
  0x2b   :  { %s382_s24 = scalar_lea.vmem %s44_s15, 256  ;;  %p387_p6 = scmp.lt.s32.totalorder %s44_s15, %s44_s15 }
  0x2c   :  { %p383_p5 = scmp.ne.s32.totalorder %s44_s15, %s382_s24  ;;  %p388_p7 = scmp.lt.s32.totalorder %s382_s24, %s382_s24 }
  0x2e   :  { %p389_p8 = por %p388_p7, %p387_p6 }
  0x30   :  { %p390_p9 = pnand %p389_p8, %p383_p5 }
  0x32   :  { %393 = shalt.err (!%p390_p9)
}
  0x33   :  { %s451_s0 = smov 128   ;;  %s452_s18 = smov 8  }
  0x34   :  { %49 = dma.hbm_to_vmem [thread:$0]  %s567_s2, 256, %s44_s15, [#allocation6], %s451_s0, %s451_s0, %s452_s18  }
  0x35   :  { %438 = dma.done.wait [#allocation3], 128  }
  0x36   :  { %439 = vsyncadd [#allocation3], 4294967168 }
  0x37   :  { %440 = dma.done.wait [#allocation6], 1280  }
  0x38   :  { %441 = vsyncadd [#allocation6], 4294966016  ;;  %v453_v0 = vmov 0.0   ;;  %vm454_vm0 = vmmov 0   ;;  %v60_v1 = vld [vmem:[#allocation7] sm:$0xff]  ;;  %v61_v2 = vld [vmem:[#allocation7 + $0x8] sm:$0xff] }
  0x39   :  { %282 = vmatprep.subr.bf16.mxu0 %v453_v0  ;;  %284 = vmatprep.mubr.msk.bf16.mxu0 %vm454_vm0, %v453_v0  ;;  %v64_v3 = vpack.c.bf16 %v61_v2, %v60_v1  ;;  %v319_v4 = vld [vmem:[#allocation2] sm:$0xff]   ;;  %v320_v5 = vld [vmem:[#allocation5] sm:$0xff]   ;;  %vm70_vm1 = vcmask 130048   ;;  %v321_v6 = vld [vmem:[#allocation5 + $0x8] sm:$0xff]   ;;  %s455_s2 = smov [#allocation8]   ;;  %s456_s28 = smov [#allocation9]  }
  0x3a   :  { %288 = vmatprep.subr.bf16.mxu1 %v453_v0  ;;  %304 = vmatprep.mubr.msk.bf16.mxu1 %vm454_vm0, %v453_v0  ;;  %v322_v7 = vld [vmem:[#allocation5 + $0x10] sm:$0xff]   ;;  %v323_v8 = vld [vmem:[#allocation5 + $0x18] sm:$0xff]   ;;  %v324_v9 = vld [vmem:[#allocation5 + $0x20] sm:$0xff]   ;;  %s232_s27 = sshll.u32 %s455_s2, 4  ;;  %s244_s29 = sshll.u32 %s456_s28, 4  ;;  %s233_s27 = int_to_ptr.vmem [resolvable:$true] %s232_s27  ;;  %s528_s29 = int_to_ptr.vmem [resolvable:$true] %s244_s29 }
  0x3b   :  { %283 = vmatpush3.bf16.msra.mxu0 %v64_v3  ;;  %289 = vmatpush3.bf16.msra.mxu1 %v320_v5  ;;  %v325_v10 = vld [vmem:[#allocation5 + $0x28] sm:$0xff]   ;;  %v326_v11 = vld [vmem:[#allocation5 + $0x30] sm:$0xff]   ;;  %v327_v12 = vld [vmem:[#allocation5 + $0x38] sm:$0xff]   ;;  %s394_s30 = scalar_lea.vmem %s233_s27, 256  ;;  %p399_p11 = scmp.lt.s32.totalorder %s233_s27, %s233_s27 }
  0x3c   :  { %290 = vmatprep.subr.bf16.mxu1 %v453_v0  ;;  %p395_p10 = scmp.ne.s32.totalorder %s233_s27, %s394_s30  ;;  %p400_p12 = scmp.lt.s32.totalorder %s394_s30, %s394_s30 }
  0x3e   :  { %285 = vmatmul.mubr.msk.bf16.vlgmr.msra.gmra.mrb[0].mxu0 %vm70_vm1, %v319_v4  ;;  %p401_p13 = por %p400_p12, %p399_p11 }
  0x3f   :  { %291 = vmatpush3.bf16.msra.mxu1 %v321_v6 }
  0x40   :  { %292 = vmatprep.subr.bf16.mxu1 %v453_v0  ;;  %p402_p0 = pnand %p401_p13, %p395_p10 }
  0x43   :  { %293 = vmatpush3.bf16.msra.mxu1 %v322_v7 }
  0x44   :  { %294 = vmatprep.subr.bf16.mxu1 %v453_v0 }
  0x47   :  { %295 = vmatpush3.bf16.msra.mxu1 %v323_v8 }
  0x48   :  { %296 = vmatprep.subr.bf16.mxu1 %v453_v0 }
  0x4b   :  { %297 = vmatpush3.bf16.msra.mxu1 %v324_v9 }
  0x4c   :  { %298 = vmatprep.subr.bf16.mxu1 %v453_v0 }
  0x4f   :  { %299 = vmatpush3.bf16.msra.mxu1 %v325_v10 }
  0x50   :  { %300 = vmatprep.subr.bf16.mxu1 %v453_v0 }
  0x53   :  { %301 = vmatpush3.bf16.msra.mxu1 %v326_v11 }
  0x54   :  { %302 = vmatprep.subr.bf16.mxu1 %v453_v0 }
  0x57   :  { %303 = vmatpush3.bf16.msra.mxu1 %v327_v12 }
 0x111   :  { %v108_v13 = vpop.f32.mrb[0].mxu0 }
 0x112   :  { %v286_v14 = vpop.f32.mrb[1].mxu0 }
 0x113   :  { %v111_v15 = vpop.f32.mrb[2].mxu0 }
 0x114   :  { %v115_v16 = vpack.c.bf16 %v111_v15, %v108_v13  ;;  %v287_v17 = vpop.f32.mrb[3].mxu0 }
 0x116   :  { %305 = vmatmul.mubr.bf16.vlgmr.msra.gmra.mrb[0].mxu1 %v115_v16 }
 0x1e9   :  { %v214_v18 = vpop.f32.mrb[0].mxu1 }
 0x1ea   :  { %221 = vst [vmem:[#allocation8] sm:$0xff] %v214_v18  ;;  %v223_v19 = vmul.f32 %v214_v18, %v60_v1  ;;  %v306_v20 = vpop.f32.mrb[1].mxu1 }
 0x1eb   :  { %v217_v21 = vpop.f32.mrb[2].mxu1 }
 0x1ec   :  { %225 = vst [vmem:[#allocation9] sm:$0xff] %v223_v19  ;;  %222 = vst [vmem:[#allocation8 + $0x8] sm:$0xff] %v217_v21  ;;  %v224_v22 = vmul.f32 %v217_v21, %v61_v2  ;;  %v307_v23 = vpop.f32.mrb[3].mxu1 }
 0x1ed   :  { %405 = shalt.err (!%p402_p0)
}
 0x1ee   :  { %s406_s7 = scalar_lea.hbm %s568_s3, 256 }
 0x1ef   :  { %p407_p1 = scmp.ne.s32.totalorder %s568_s3, %s406_s7  ;;  %p410_p2 = scmp.lt.u32.totalorder %s406_s7, %s568_s3 }
 0x1f1   :  { %p412_p3 = pnand %p410_p2, %p407_p1 }
 0x1f3   :  { %415 = shalt.err (!%p412_p3)
}
 0x1f4   :  { %238 = dma.vmem_to_hbm [thread:$0]  %s233_s27, 256, %s568_s3, [#allocation4], %s451_s0, %s451_s0, %s452_s18   ;;  %226 = vst [vmem:[#allocation9 + $0x8] sm:$0xff] %v224_v22 }
 0x1f5   :  { %s416_s13 = scalar_lea.vmem %s528_s29, 256  ;;  %p421_p5 = scmp.lt.s32.totalorder %s528_s29, %s528_s29 }
 0x1f6   :  { %p417_p4 = scmp.ne.s32.totalorder %s528_s29, %s416_s13  ;;  %p422_p6 = scmp.lt.s32.totalorder %s416_s13, %s416_s13 }
 0x1f8   :  { %p423_p7 = por %p422_p6, %p421_p5 }
 0x1fa   :  { %p424_p8 = pnand %p423_p7, %p417_p4 }
 0x1fc   :  { %427 = shalt.err (!%p424_p8)
}
 0x1fd   :  { %s428_s16 = scalar_lea.hbm %s569_s4, 256 }
 0x1fe   :  { %p429_p9 = scmp.ne.s32.totalorder %s569_s4, %s428_s16  ;;  %p432_p10 = scmp.lt.u32.totalorder %s428_s16, %s569_s4 }
 0x200   :  { %p434_p11 = pnand %p432_p10, %p429_p9 }
 0x202   :  { %437 = shalt.err (!%p434_p11)
}
 0x203   :  { %250 = dma.vmem_to_hbm [thread:$0]  %s528_s29, 256, %s569_s4, [#allocation10], %s451_s0, %s451_s0, %s452_s18  }
 0x204   :  { %442 = dma.done.wait [#allocation4], 256  }
 0x205   :  { %443 = vsyncadd [#allocation4], 4294967040 }
 0x206   :  { %444 = dma.done.wait [#allocation10], 256  }
 0x207   :  { %445 = vsyncadd [#allocation10], 4294967040 }
 0x208   :  { %257 = vsyncpa [#allocation3], 1 }
 0x209   :  { %258 = vsyncpa [#allocation6], 1 }
 0x20a   :  { %259 = vsyncpa [#allocation4], 1 }
 0x20b   :  { %260 = vsyncpa [#allocation10], 1 }

</bundles_post_ra>
